<compile_context>
chip_gen: v7x
topology: tpu7x:2x2x1
jax: 0.10.0
libtpu: 0.0.40
codegen_flags: <defaults>
</compile_context>

<pallas_src>
import functools

import jax
import jax.numpy as jnp
from jax.experimental import pallas as pl
from jax.experimental.pallas import tpu as pltpu

EPS = 1e-5  # torch.nn.InstanceNorm2d default


def _residual_block_kernel(x_ref, w1_ref, w2_ref, o_ref, *, H: int, W: int):
    # x_ref block: (1, C, H*W) -- channels on sublanes, spatial on lanes.
    # w*_ref:      (9, C, C)   -- tap k = 3*dy + dx with (dy, dx) offsets in
    #                             {-1, 0, +1}; w_ref[k] is the (C_out, C_in)
    #                             matrix for that tap.
    C = x_ref.shape[1]
    HW = H * W
    x = x_ref[0]                                             # (C, HW) f32

    # Boundary masks at (1, HW); jnp.where broadcasts them over the sublane
    # (channel) axis.  They mark where ReflectionPad2d(1) changes the
    # neighbor index.
    flat = jax.lax.broadcasted_iota(jnp.int32, (1, HW), 1)
    if (W & (W - 1)) == 0:
        col = flat & (W - 1)                                 # cheap mod for pow2 W
    else:
        col = flat % W
    first_col = col == 0
    last_col = col == W - 1
    first_row = flat < W
    last_row = flat >= (H - 1) * W

    def conv3x3(t, w_ref):
        # Row-shifted views (pixel one row above / below, with reflection).
        prev_row = pltpu.roll(t, shift=W, axis=1)            # t[i - W]
        next_row = pltpu.roll(t, shift=HW - W, axis=1)       # t[i + W]
        above = jnp.where(first_row, next_row, prev_row)     # row -1 -> row 1
        below = jnp.where(last_row, prev_row, next_row)      # row H  -> row H-2

        acc = None
        for r, row in enumerate((above, t, below)):          # dy = -1, 0, +1
            # Column-shifted views of this row (with reflection).
            prev_col = pltpu.roll(row, shift=1, axis=1)       # row[i - 1]
            next_col = pltpu.roll(row, shift=HW - 1, axis=1)  # row[i + 1]
            left = jnp.where(first_col, next_col, prev_col)   # col -1 -> col 1
            right = jnp.where(last_col, prev_col, next_col)   # col W  -> col W-2
            for c, tap in enumerate((left, row, right)):      # dx = -1, 0, +1
                k = 3 * r + c
                d = jnp.dot(w_ref[k], tap,
                            preferred_element_type=jnp.float32)   # (C, HW)
                acc = d if acc is None else acc + d
        return acc

    def instance_norm(t):
        # Per-channel stats over the spatial (lane) axis; biased variance.
        mean = jnp.mean(t, axis=1, keepdims=True)
        cent = t - mean
        var = jnp.mean(cent * cent, axis=1, keepdims=True)
        return cent * jax.lax.rsqrt(var + EPS)

    y = conv3x3(x, w1_ref)
    y = jnp.maximum(instance_norm(y), 0.0)                    # ReLU
    y = conv3x3(y, w2_ref)
    y = instance_norm(y)
    o_ref[0] = x + y                                           # residual add


def residual_block(x_nchw, w1, b1, w2, b2):
    """x_nchw: (N, C, H, W) f32; w*: (C, C, 3, 3) OIHW (PyTorch); b*: (C,).

    b1/b2 are accepted for interface parity but have no effect on the output:
    a per-channel constant added right before InstanceNorm is removed exactly
    by its mean subtraction, so they are not passed to the kernel.
    """
    del b1, b2
    N, C, H, W = x_nchw.shape
    HW = H * W
    Cp = max(8, ((C + 7) // 8) * 8)        # pad channels to the f32 sublane tile

    # Free (contiguous) reshape: the long spatial axis becomes the lane axis.
    x_flat = x_nchw.reshape(N, C, HW).astype(jnp.float32)
    if Cp != C:
        x_flat = jnp.pad(x_flat, ((0, 0), (0, Cp - C), (0, 0)))

    def weights_taps(w):
        # (C_out, C_in, 3, 3) -> (9, C_out, C_in): one (C, C) matrix per tap,
        # k = 3*dy + dx, matching the in-kernel tap ordering.
        w9 = jnp.transpose(w, (2, 3, 0, 1)).reshape(9, C, C).astype(jnp.float32)
        if Cp != C:
            w9 = jnp.pad(w9, ((0, 0), (0, Cp - C), (0, Cp - C)))
        return w9

    w1_9 = weights_taps(w1)
    w2_9 = weights_taps(w2)

    kernel = functools.partial(_residual_block_kernel, H=H, W=W)

    out_flat = pl.pallas_call(
        kernel,
        out_shape=jax.ShapeDtypeStruct((N, Cp, HW), jnp.float32),
        grid_spec=pltpu.PrefetchScalarGridSpec(
            num_scalar_prefetch=0,
            grid=(N,),
            in_specs=[
                pl.BlockSpec((1, Cp, HW), lambda n: (n, 0, 0)),
                pl.BlockSpec((9, Cp, Cp), lambda n: (0, 0, 0)),
                pl.BlockSpec((9, Cp, Cp), lambda n: (0, 0, 0)),
            ],
            out_specs=pl.BlockSpec((1, Cp, HW), lambda n: (n, 0, 0)),
        ),
        compiler_params=pltpu.CompilerParams(
            dimension_semantics=("parallel",),
            vmem_limit_bytes=48 * 1024 * 1024,
        ),
    )(x_flat, w1_9, w2_9)

    return out_flat[:, :C, :].reshape(N, C, H, W)


def residual_block_ref(x_nchw, w1, b1, w2, b2):
    """Pure-JAX reference matching PyTorch ResidualBlock semantics (NCHW)."""
    def conv(x, w, b):
        xp = jnp.pad(x, ((0, 0), (0, 0), (1, 1), (1, 1)), mode="reflect")
        y = jax.lax.conv_general_dilated(
            xp, w, (1, 1), "VALID",
            dimension_numbers=("NCHW", "OIHW", "NCHW"),
            precision=jax.lax.Precision.HIGHEST)
        return y + b.reshape(1, -1, 1, 1)

    def inorm(x):
        m = x.mean(axis=(2, 3), keepdims=True)
        v = ((x - m) ** 2).mean(axis=(2, 3), keepdims=True)
        return (x - m) * jax.lax.rsqrt(v + EPS)

    y = conv(x_nchw, w1, b1)
    y = jnp.maximum(inorm(y), 0.0)
    y = conv(y, w2, b2)
    y = inorm(y)
    return x_nchw + y


if __name__ == "__main__":
    N, C, H, W = 2, 4, 16, 16
    key = jax.random.PRNGKey(0)
    kx, kw1, kb1, kw2, kb2 = jax.random.split(key, 5)

    x = jax.random.normal(kx, (N, C, H, W), dtype=jnp.float32)
    # Conv2d(in_features, in_features, 3) parameters in PyTorch OIHW layout.
    w1 = 0.1 * jax.random.normal(kw1, (C, C, 3, 3), dtype=jnp.float32)
    b1 = 0.1 * jax.random.normal(kb1, (C,), dtype=jnp.float32)
    w2 = 0.1 * jax.random.normal(kw2, (C, C, 3, 3), dtype=jnp.float32)
    b2 = 0.1 * jax.random.normal(kb2, (C,), dtype=jnp.float32)

    out = jax.block_until_ready(residual_block(x, w1, b1, w2, b2))
    ref = jax.block_until_ready(residual_block_ref(x, w1, b1, w2, b2))

    assert out.shape == (N, C, H, W) and out.dtype == jnp.float32
    max_err = float(jnp.max(jnp.abs(out - ref)))
    assert jnp.allclose(out, ref, atol=1e-4, rtol=1e-4), max_err
    print("KERNEL_OK")
</pallas_src>

<mosaic_0001>
module attributes {stable_mosaic.version = 11 : i64} {
  func.func @_residual_block_kernel(%arg0: i32, %arg1: memref<1x8x256xf32, #tpu.memory_space<vmem>>, %arg2: memref<9x8x8xf32, #tpu.memory_space<vmem>>, %arg3: memref<9x8x8xf32, #tpu.memory_space<vmem>>, %arg4: memref<1x8x256xf32, #tpu.memory_space<vmem>>) attributes {dimension_semantics = [#tpu.dimension_semantics<parallel>], iteration_bounds = array<i64: 2>, scalar_prefetch = 0 : i64, scratch_operands = 0 : i64, tpu.core_type = #tpu.core_type<tc>, window_params = [{transform_indices = @transform_0, window_bounds = array<i64: 1, 8, 256>}, {pipeline_mode = #tpu.pipeline_mode<synchronous>, transform_indices = @transform_1, window_bounds = array<i64: 9, 8, 8>}, {pipeline_mode = #tpu.pipeline_mode<synchronous>, transform_indices = @transform_2, window_bounds = array<i64: 9, 8, 8>}, {transform_indices = @transform_3, window_bounds = array<i64: 1, 8, 256>}]} {
    %c0 = arith.constant 0 : index
    %c0_0 = arith.constant 0 : index
    %c0_1 = arith.constant 0 : index
    %0 = vector.load %arg1[%c0, %c0_0, %c0_1] : memref<1x8x256xf32, #tpu.memory_space<vmem>>, vector<1x8x256xf32>
    %1 = vector.shape_cast %0 : vector<1x8x256xf32> to vector<8x256xf32>
    %2 = tpu.iota {dimensions = array<i32: 1>} : vector<1x256xi32>
    %c15_i32 = arith.constant 15 : i32
    %3 = vector.broadcast %c15_i32 : i32 to vector<1x256xi32>
    %4 = arith.andi %2, %3 : vector<1x256xi32>
    %c0_i32 = arith.constant 0 : i32
    %5 = vector.broadcast %c0_i32 : i32 to vector<1x256xi32>
    %6 = arith.cmpi eq, %4, %5 : vector<1x256xi32>
    %c15_i32_2 = arith.constant 15 : i32
    %7 = vector.broadcast %c15_i32_2 : i32 to vector<1x256xi32>
    %8 = arith.cmpi eq, %4, %7 : vector<1x256xi32>
    %c16_i32 = arith.constant 16 : i32
    %9 = vector.broadcast %c16_i32 : i32 to vector<1x256xi32>
    %10 = arith.cmpi slt, %2, %9 : vector<1x256xi32>
    %c240_i32 = arith.constant 240 : i32
    %11 = vector.broadcast %c240_i32 : i32 to vector<1x256xi32>
    %12 = arith.cmpi sge, %2, %11 : vector<1x256xi32>
    %c16_i32_3 = arith.constant 16 : i32
    %13 = tpu.dynamic_rotate %1 by %c16_i32_3 dim 1 : vector<8x256xf32>, i32 -> vector<8x256xf32>
    %c240_i32_4 = arith.constant 240 : i32
    %14 = tpu.dynamic_rotate %1 by %c240_i32_4 dim 1 : vector<8x256xf32>, i32 -> vector<8x256xf32>
    %15 = vector.shape_cast %10 : vector<1x256xi1> to vector<1x256xi1>
    %16 = vector.broadcast %15 : vector<1x256xi1> to vector<8x256xi1>
    %17 = arith.select %16, %14, %13 : vector<8x256xi1>, vector<8x256xf32>
    %18 = vector.shape_cast %12 : vector<1x256xi1> to vector<1x256xi1>
    %19 = vector.broadcast %18 : vector<1x256xi1> to vector<8x256xi1>
    %20 = arith.select %19, %13, %14 : vector<8x256xi1>, vector<8x256xf32>
    %c1_i32 = arith.constant 1 : i32
    %21 = tpu.dynamic_rotate %17 by %c1_i32 dim 1 : vector<8x256xf32>, i32 -> vector<8x256xf32>
    %c255_i32 = arith.constant 255 : i32
    %22 = tpu.dynamic_rotate %17 by %c255_i32 dim 1 : vector<8x256xf32>, i32 -> vector<8x256xf32>
    %23 = vector.shape_cast %6 : vector<1x256xi1> to vector<1x256xi1>
    %24 = vector.broadcast %23 : vector<1x256xi1> to vector<8x256xi1>
    %25 = arith.select %24, %22, %21 : vector<8x256xi1>, vector<8x256xf32>
    %26 = vector.shape_cast %8 : vector<1x256xi1> to vector<1x256xi1>
    %27 = vector.broadcast %26 : vector<1x256xi1> to vector<8x256xi1>
    %28 = arith.select %27, %21, %22 : vector<8x256xi1>, vector<8x256xf32>
    %c0_5 = arith.constant 0 : index
    %c0_6 = arith.constant 0 : index
    %c0_7 = arith.constant 0 : index
    %29 = vector.load %arg2[%c0_5, %c0_6, %c0_7] : memref<9x8x8xf32, #tpu.memory_space<vmem>>, vector<1x8x8xf32>
    %30 = vector.shape_cast %29 : vector<1x8x8xf32> to vector<8x8xf32>
    %cst = arith.constant dense<0.000000e+00> : vector<8x256xf32>
    %31 = tpu.matmul %30, %25, %cst {dimension_numbers = #tpu.dot_dimension_numbers<[1], [0], [0], [1], [0, 0, 1, 1], [], []>} : vector<8x8xf32>, vector<8x256xf32>, vector<8x256xf32> -> vector<8x256xf32>
    %c1 = arith.constant 1 : index
    %c0_8 = arith.constant 0 : index
    %c0_9 = arith.constant 0 : index
    %32 = vector.load %arg2[%c1, %c0_8, %c0_9] : memref<9x8x8xf32, #tpu.memory_space<vmem>>, vector<1x8x8xf32>
    %33 = vector.shape_cast %32 : vector<1x8x8xf32> to vector<8x8xf32>
    %cst_10 = arith.constant dense<0.000000e+00> : vector<8x256xf32>
    %34 = tpu.matmul %33, %17, %cst_10 {dimension_numbers = #tpu.dot_dimension_numbers<[1], [0], [0], [1], [0, 0, 1, 1], [], []>} : vector<8x8xf32>, vector<8x256xf32>, vector<8x256xf32> -> vector<8x256xf32>
    %35 = arith.addf %31, %34 : vector<8x256xf32>
    %c2 = arith.constant 2 : index
    %c0_11 = arith.constant 0 : index
    %c0_12 = arith.constant 0 : index
    %36 = vector.load %arg2[%c2, %c0_11, %c0_12] : memref<9x8x8xf32, #tpu.memory_space<vmem>>, vector<1x8x8xf32>
    %37 = vector.shape_cast %36 : vector<1x8x8xf32> to vector<8x8xf32>
    %cst_13 = arith.constant dense<0.000000e+00> : vector<8x256xf32>
    %38 = tpu.matmul %37, %28, %cst_13 {dimension_numbers = #tpu.dot_dimension_numbers<[1], [0], [0], [1], [0, 0, 1, 1], [], []>} : vector<8x8xf32>, vector<8x256xf32>, vector<8x256xf32> -> vector<8x256xf32>
    %39 = arith.addf %35, %38 : vector<8x256xf32>
    %c1_i32_14 = arith.constant 1 : i32
    %40 = tpu.dynamic_rotate %1 by %c1_i32_14 dim 1 : vector<8x256xf32>, i32 -> vector<8x256xf32>
    %c255_i32_15 = arith.constant 255 : i32
    %41 = tpu.dynamic_rotate %1 by %c255_i32_15 dim 1 : vector<8x256xf32>, i32 -> vector<8x256xf32>
    %42 = vector.shape_cast %6 : vector<1x256xi1> to vector<1x256xi1>
    %43 = vector.broadcast %42 : vector<1x256xi1> to vector<8x256xi1>
    %44 = arith.select %43, %41, %40 : vector<8x256xi1>, vector<8x256xf32>
    %45 = vector.shape_cast %8 : vector<1x256xi1> to vector<1x256xi1>
    %46 = vector.broadcast %45 : vector<1x256xi1> to vector<8x256xi1>
    %47 = arith.select %46, %40, %41 : vector<8x256xi1>, vector<8x256xf32>
    %c3 = arith.constant 3 : index
    %c0_16 = arith.constant 0 : index
    %c0_17 = arith.constant 0 : index
    %48 = vector.load %arg2[%c3, %c0_16, %c0_17] : memref<9x8x8xf32, #tpu.memory_space<vmem>>, vector<1x8x8xf32>
    %49 = vector.shape_cast %48 : vector<1x8x8xf32> to vector<8x8xf32>
    %cst_18 = arith.constant dense<0.000000e+00> : vector<8x256xf32>
    %50 = tpu.matmul %49, %44, %cst_18 {dimension_numbers = #tpu.dot_dimension_numbers<[1], [0], [0], [1], [0, 0, 1, 1], [], []>} : vector<8x8xf32>, vector<8x256xf32>, vector<8x256xf32> -> vector<8x256xf32>
    %51 = arith.addf %39, %50 : vector<8x256xf32>
    %c4 = arith.constant 4 : index
    %c0_19 = arith.constant 0 : index
    %c0_20 = arith.constant 0 : index
    %52 = vector.load %arg2[%c4, %c0_19, %c0_20] : memref<9x8x8xf32, #tpu.memory_space<vmem>>, vector<1x8x8xf32>
    %53 = vector.shape_cast %52 : vector<1x8x8xf32> to vector<8x8xf32>
    %cst_21 = arith.constant dense<0.000000e+00> : vector<8x256xf32>
    %54 = tpu.matmul %53, %1, %cst_21 {dimension_numbers = #tpu.dot_dimension_numbers<[1], [0], [0], [1], [0, 0, 1, 1], [], []>} : vector<8x8xf32>, vector<8x256xf32>, vector<8x256xf32> -> vector<8x256xf32>
    %55 = arith.addf %51, %54 : vector<8x256xf32>
    %c5 = arith.constant 5 : index
    %c0_22 = arith.constant 0 : index
    %c0_23 = arith.constant 0 : index
    %56 = vector.load %arg2[%c5, %c0_22, %c0_23] : memref<9x8x8xf32, #tpu.memory_space<vmem>>, vector<1x8x8xf32>
    %57 = vector.shape_cast %56 : vector<1x8x8xf32> to vector<8x8xf32>
    %cst_24 = arith.constant dense<0.000000e+00> : vector<8x256xf32>
    %58 = tpu.matmul %57, %47, %cst_24 {dimension_numbers = #tpu.dot_dimension_numbers<[1], [0], [0], [1], [0, 0, 1, 1], [], []>} : vector<8x8xf32>, vector<8x256xf32>, vector<8x256xf32> -> vector<8x256xf32>
    %59 = arith.addf %55, %58 : vector<8x256xf32>
    %c1_i32_25 = arith.constant 1 : i32
    %60 = tpu.dynamic_rotate %20 by %c1_i32_25 dim 1 : vector<8x256xf32>, i32 -> vector<8x256xf32>
    %c255_i32_26 = arith.constant 255 : i32
    %61 = tpu.dynamic_rotate %20 by %c255_i32_26 dim 1 : vector<8x256xf32>, i32 -> vector<8x256xf32>
    %62 = vector.shape_cast %6 : vector<1x256xi1> to vector<1x256xi1>
    %63 = vector.broadcast %62 : vector<1x256xi1> to vector<8x256xi1>
    %64 = arith.select %63, %61, %60 : vector<8x256xi1>, vector<8x256xf32>
    %65 = vector.shape_cast %8 : vector<1x256xi1> to vector<1x256xi1>
    %66 = vector.broadcast %65 : vector<1x256xi1> to vector<8x256xi1>
    %67 = arith.select %66, %60, %61 : vector<8x256xi1>, vector<8x256xf32>
    %c6 = arith.constant 6 : index
    %c0_27 = arith.constant 0 : index
    %c0_28 = arith.constant 0 : index
    %68 = vector.load %arg2[%c6, %c0_27, %c0_28] : memref<9x8x8xf32, #tpu.memory_space<vmem>>, vector<1x8x8xf32>
    %69 = vector.shape_cast %68 : vector<1x8x8xf32> to vector<8x8xf32>
    %cst_29 = arith.constant dense<0.000000e+00> : vector<8x256xf32>
    %70 = tpu.matmul %69, %64, %cst_29 {dimension_numbers = #tpu.dot_dimension_numbers<[1], [0], [0], [1], [0, 0, 1, 1], [], []>} : vector<8x8xf32>, vector<8x256xf32>, vector<8x256xf32> -> vector<8x256xf32>
    %71 = arith.addf %59, %70 : vector<8x256xf32>
    %c7 = arith.constant 7 : index
    %c0_30 = arith.constant 0 : index
    %c0_31 = arith.constant 0 : index
    %72 = vector.load %arg2[%c7, %c0_30, %c0_31] : memref<9x8x8xf32, #tpu.memory_space<vmem>>, vector<1x8x8xf32>
    %73 = vector.shape_cast %72 : vector<1x8x8xf32> to vector<8x8xf32>
    %cst_32 = arith.constant dense<0.000000e+00> : vector<8x256xf32>
    %74 = tpu.matmul %73, %20, %cst_32 {dimension_numbers = #tpu.dot_dimension_numbers<[1], [0], [0], [1], [0, 0, 1, 1], [], []>} : vector<8x8xf32>, vector<8x256xf32>, vector<8x256xf32> -> vector<8x256xf32>
    %75 = arith.addf %71, %74 : vector<8x256xf32>
    %c8 = arith.constant 8 : index
    %c0_33 = arith.constant 0 : index
    %c0_34 = arith.constant 0 : index
    %76 = vector.load %arg2[%c8, %c0_33, %c0_34] : memref<9x8x8xf32, #tpu.memory_space<vmem>>, vector<1x8x8xf32>
    %77 = vector.shape_cast %76 : vector<1x8x8xf32> to vector<8x8xf32>
    %cst_35 = arith.constant dense<0.000000e+00> : vector<8x256xf32>
    %78 = tpu.matmul %77, %67, %cst_35 {dimension_numbers = #tpu.dot_dimension_numbers<[1], [0], [0], [1], [0, 0, 1, 1], [], []>} : vector<8x8xf32>, vector<8x256xf32>, vector<8x256xf32> -> vector<8x256xf32>
    %79 = arith.addf %75, %78 : vector<8x256xf32>
    %cst_36 = arith.constant dense<0.000000e+00> : vector<8xf32>
    %80 = vector.multi_reduction <add>, %79, %cst_36 [1] : vector<8x256xf32> to vector<8xf32>
    %81 = vector.shape_cast %80 : vector<8xf32> to vector<8x1xf32>
    %cst_37 = arith.constant 2.560000e+02 : f32
    %82 = vector.broadcast %cst_37 : f32 to vector<8x1xf32>
    %83 = arith.divf %81, %82 : vector<8x1xf32>
    %84 = vector.broadcast %83 : vector<8x1xf32> to vector<8x256xf32>
    %85 = arith.subf %79, %84 : vector<8x256xf32>
    %86 = arith.mulf %85, %85 : vector<8x256xf32>
    %cst_38 = arith.constant dense<0.000000e+00> : vector<8xf32>
    %87 = vector.multi_reduction <add>, %86, %cst_38 [1] : vector<8x256xf32> to vector<8xf32>
    %88 = vector.shape_cast %87 : vector<8xf32> to vector<8x1xf32>
    %cst_39 = arith.constant 2.560000e+02 : f32
    %89 = vector.broadcast %cst_39 : f32 to vector<8x1xf32>
    %90 = arith.divf %88, %89 : vector<8x1xf32>
    %cst_40 = arith.constant 9.99999974E-6 : f32
    %91 = vector.broadcast %cst_40 : f32 to vector<8x1xf32>
    %92 = arith.addf %90, %91 : vector<8x1xf32>
    %93 = math.rsqrt %92 : vector<8x1xf32>
    %94 = vector.broadcast %93 : vector<8x1xf32> to vector<8x256xf32>
    %95 = arith.mulf %85, %94 : vector<8x256xf32>
    %cst_41 = arith.constant 0.000000e+00 : f32
    %96 = vector.broadcast %cst_41 : f32 to vector<8x256xf32>
    %97 = arith.maximumf %95, %96 : vector<8x256xf32>
    %c16_i32_42 = arith.constant 16 : i32
    %98 = tpu.dynamic_rotate %97 by %c16_i32_42 dim 1 : vector<8x256xf32>, i32 -> vector<8x256xf32>
    %c240_i32_43 = arith.constant 240 : i32
    %99 = tpu.dynamic_rotate %97 by %c240_i32_43 dim 1 : vector<8x256xf32>, i32 -> vector<8x256xf32>
    %100 = vector.shape_cast %10 : vector<1x256xi1> to vector<1x256xi1>
    %101 = vector.broadcast %100 : vector<1x256xi1> to vector<8x256xi1>
    %102 = arith.select %101, %99, %98 : vector<8x256xi1>, vector<8x256xf32>
    %103 = vector.shape_cast %12 : vector<1x256xi1> to vector<1x256xi1>
    %104 = vector.broadcast %103 : vector<1x256xi1> to vector<8x256xi1>
    %105 = arith.select %104, %98, %99 : vector<8x256xi1>, vector<8x256xf32>
    %c1_i32_44 = arith.constant 1 : i32
    %106 = tpu.dynamic_rotate %102 by %c1_i32_44 dim 1 : vector<8x256xf32>, i32 -> vector<8x256xf32>
    %c255_i32_45 = arith.constant 255 : i32
    %107 = tpu.dynamic_rotate %102 by %c255_i32_45 dim 1 : vector<8x256xf32>, i32 -> vector<8x256xf32>
    %108 = vector.shape_cast %6 : vector<1x256xi1> to vector<1x256xi1>
    %109 = vector.broadcast %108 : vector<1x256xi1> to vector<8x256xi1>
    %110 = arith.select %109, %107, %106 : vector<8x256xi1>, vector<8x256xf32>
    %111 = vector.shape_cast %8 : vector<1x256xi1> to vector<1x256xi1>
    %112 = vector.broadcast %111 : vector<1x256xi1> to vector<8x256xi1>
    %113 = arith.select %112, %106, %107 : vector<8x256xi1>, vector<8x256xf32>
    %c0_46 = arith.constant 0 : index
    %c0_47 = arith.constant 0 : index
    %c0_48 = arith.constant 0 : index
    %114 = vector.load %arg3[%c0_46, %c0_47, %c0_48] : memref<9x8x8xf32, #tpu.memory_space<vmem>>, vector<1x8x8xf32>
    %115 = vector.shape_cast %114 : vector<1x8x8xf32> to vector<8x8xf32>
    %cst_49 = arith.constant dense<0.000000e+00> : vector<8x256xf32>
    %116 = tpu.matmul %115, %110, %cst_49 {dimension_numbers = #tpu.dot_dimension_numbers<[1], [0], [0], [1], [0, 0, 1, 1], [], []>} : vector<8x8xf32>, vector<8x256xf32>, vector<8x256xf32> -> vector<8x256xf32>
    %c1_50 = arith.constant 1 : index
    %c0_51 = arith.constant 0 : index
    %c0_52 = arith.constant 0 : index
    %117 = vector.load %arg3[%c1_50, %c0_51, %c0_52] : memref<9x8x8xf32, #tpu.memory_space<vmem>>, vector<1x8x8xf32>
    %118 = vector.shape_cast %117 : vector<1x8x8xf32> to vector<8x8xf32>
    %cst_53 = arith.constant dense<0.000000e+00> : vector<8x256xf32>
    %119 = tpu.matmul %118, %102, %cst_53 {dimension_numbers = #tpu.dot_dimension_numbers<[1], [0], [0], [1], [0, 0, 1, 1], [], []>} : vector<8x8xf32>, vector<8x256xf32>, vector<8x256xf32> -> vector<8x256xf32>
    %120 = arith.addf %116, %119 : vector<8x256xf32>
    %c2_54 = arith.constant 2 : index
    %c0_55 = arith.constant 0 : index
    %c0_56 = arith.constant 0 : index
    %121 = vector.load %arg3[%c2_54, %c0_55, %c0_56] : memref<9x8x8xf32, #tpu.memory_space<vmem>>, vector<1x8x8xf32>
    %122 = vector.shape_cast %121 : vector<1x8x8xf32> to vector<8x8xf32>
    %cst_57 = arith.constant dense<0.000000e+00> : vector<8x256xf32>
    %123 = tpu.matmul %122, %113, %cst_57 {dimension_numbers = #tpu.dot_dimension_numbers<[1], [0], [0], [1], [0, 0, 1, 1], [], []>} : vector<8x8xf32>, vector<8x256xf32>, vector<8x256xf32> -> vector<8x256xf32>
    %124 = arith.addf %120, %123 : vector<8x256xf32>
    %c1_i32_58 = arith.constant 1 : i32
    %125 = tpu.dynamic_rotate %97 by %c1_i32_58 dim 1 : vector<8x256xf32>, i32 -> vector<8x256xf32>
    %c255_i32_59 = arith.constant 255 : i32
    %126 = tpu.dynamic_rotate %97 by %c255_i32_59 dim 1 : vector<8x256xf32>, i32 -> vector<8x256xf32>
    %127 = vector.shape_cast %6 : vector<1x256xi1> to vector<1x256xi1>
    %128 = vector.broadcast %127 : vector<1x256xi1> to vector<8x256xi1>
    %129 = arith.select %128, %126, %125 : vector<8x256xi1>, vector<8x256xf32>
    %130 = vector.shape_cast %8 : vector<1x256xi1> to vector<1x256xi1>
    %131 = vector.broadcast %130 : vector<1x256xi1> to vector<8x256xi1>
    %132 = arith.select %131, %125, %126 : vector<8x256xi1>, vector<8x256xf32>
    %c3_60 = arith.constant 3 : index
    %c0_61 = arith.constant 0 : index
    %c0_62 = arith.constant 0 : index
    %133 = vector.load %arg3[%c3_60, %c0_61, %c0_62] : memref<9x8x8xf32, #tpu.memory_space<vmem>>, vector<1x8x8xf32>
    %134 = vector.shape_cast %133 : vector<1x8x8xf32> to vector<8x8xf32>
    %cst_63 = arith.constant dense<0.000000e+00> : vector<8x256xf32>
    %135 = tpu.matmul %134, %129, %cst_63 {dimension_numbers = #tpu.dot_dimension_numbers<[1], [0], [0], [1], [0, 0, 1, 1], [], []>} : vector<8x8xf32>, vector<8x256xf32>, vector<8x256xf32> -> vector<8x256xf32>
    %136 = arith.addf %124, %135 : vector<8x256xf32>
    %c4_64 = arith.constant 4 : index
    %c0_65 = arith.constant 0 : index
    %c0_66 = arith.constant 0 : index
    %137 = vector.load %arg3[%c4_64, %c0_65, %c0_66] : memref<9x8x8xf32, #tpu.memory_space<vmem>>, vector<1x8x8xf32>
    %138 = vector.shape_cast %137 : vector<1x8x8xf32> to vector<8x8xf32>
    %cst_67 = arith.constant dense<0.000000e+00> : vector<8x256xf32>
    %139 = tpu.matmul %138, %97, %cst_67 {dimension_numbers = #tpu.dot_dimension_numbers<[1], [0], [0], [1], [0, 0, 1, 1], [], []>} : vector<8x8xf32>, vector<8x256xf32>, vector<8x256xf32> -> vector<8x256xf32>
    %140 = arith.addf %136, %139 : vector<8x256xf32>
    %c5_68 = arith.constant 5 : index
    %c0_69 = arith.constant 0 : index
    %c0_70 = arith.constant 0 : index
    %141 = vector.load %arg3[%c5_68, %c0_69, %c0_70] : memref<9x8x8xf32, #tpu.memory_space<vmem>>, vector<1x8x8xf32>
    %142 = vector.shape_cast %141 : vector<1x8x8xf32> to vector<8x8xf32>
    %cst_71 = arith.constant dense<0.000000e+00> : vector<8x256xf32>
    %143 = tpu.matmul %142, %132, %cst_71 {dimension_numbers = #tpu.dot_dimension_numbers<[1], [0], [0], [1], [0, 0, 1, 1], [], []>} : vector<8x8xf32>, vector<8x256xf32>, vector<8x256xf32> -> vector<8x256xf32>
    %144 = arith.addf %140, %143 : vector<8x256xf32>
    %c1_i32_72 = arith.constant 1 : i32
    %145 = tpu.dynamic_rotate %105 by %c1_i32_72 dim 1 : vector<8x256xf32>, i32 -> vector<8x256xf32>
    %c255_i32_73 = arith.constant 255 : i32
    %146 = tpu.dynamic_rotate %105 by %c255_i32_73 dim 1 : vector<8x256xf32>, i32 -> vector<8x256xf32>
    %147 = vector.shape_cast %6 : vector<1x256xi1> to vector<1x256xi1>
    %148 = vector.broadcast %147 : vector<1x256xi1> to vector<8x256xi1>
    %149 = arith.select %148, %146, %145 : vector<8x256xi1>, vector<8x256xf32>
    %150 = vector.shape_cast %8 : vector<1x256xi1> to vector<1x256xi1>
    %151 = vector.broadcast %150 : vector<1x256xi1> to vector<8x256xi1>
    %152 = arith.select %151, %145, %146 : vector<8x256xi1>, vector<8x256xf32>
    %c6_74 = arith.constant 6 : index
    %c0_75 = arith.constant 0 : index
    %c0_76 = arith.constant 0 : index
    %153 = vector.load %arg3[%c6_74, %c0_75, %c0_76] : memref<9x8x8xf32, #tpu.memory_space<vmem>>, vector<1x8x8xf32>
    %154 = vector.shape_cast %153 : vector<1x8x8xf32> to vector<8x8xf32>
    %cst_77 = arith.constant dense<0.000000e+00> : vector<8x256xf32>
    %155 = tpu.matmul %154, %149, %cst_77 {dimension_numbers = #tpu.dot_dimension_numbers<[1], [0], [0], [1], [0, 0, 1, 1], [], []>} : vector<8x8xf32>, vector<8x256xf32>, vector<8x256xf32> -> vector<8x256xf32>
    %156 = arith.addf %144, %155 : vector<8x256xf32>
    %c7_78 = arith.constant 7 : index
    %c0_79 = arith.constant 0 : index
    %c0_80 = arith.constant 0 : index
    %157 = vector.load %arg3[%c7_78, %c0_79, %c0_80] : memref<9x8x8xf32, #tpu.memory_space<vmem>>, vector<1x8x8xf32>
    %158 = vector.shape_cast %157 : vector<1x8x8xf32> to vector<8x8xf32>
    %cst_81 = arith.constant dense<0.000000e+00> : vector<8x256xf32>
    %159 = tpu.matmul %158, %105, %cst_81 {dimension_numbers = #tpu.dot_dimension_numbers<[1], [0], [0], [1], [0, 0, 1, 1], [], []>} : vector<8x8xf32>, vector<8x256xf32>, vector<8x256xf32> -> vector<8x256xf32>
    %160 = arith.addf %156, %159 : vector<8x256xf32>
    %c8_82 = arith.constant 8 : index
    %c0_83 = arith.constant 0 : index
    %c0_84 = arith.constant 0 : index
    %161 = vector.load %arg3[%c8_82, %c0_83, %c0_84] : memref<9x8x8xf32, #tpu.memory_space<vmem>>, vector<1x8x8xf32>
    %162 = vector.shape_cast %161 : vector<1x8x8xf32> to vector<8x8xf32>
    %cst_85 = arith.constant dense<0.000000e+00> : vector<8x256xf32>
    %163 = tpu.matmul %162, %152, %cst_85 {dimension_numbers = #tpu.dot_dimension_numbers<[1], [0], [0], [1], [0, 0, 1, 1], [], []>} : vector<8x8xf32>, vector<8x256xf32>, vector<8x256xf32> -> vector<8x256xf32>
    %164 = arith.addf %160, %163 : vector<8x256xf32>
    %cst_86 = arith.constant dense<0.000000e+00> : vector<8xf32>
    %165 = vector.multi_reduction <add>, %164, %cst_86 [1] : vector<8x256xf32> to vector<8xf32>
    %166 = vector.shape_cast %165 : vector<8xf32> to vector<8x1xf32>
    %cst_87 = arith.constant 2.560000e+02 : f32
    %167 = vector.broadcast %cst_87 : f32 to vector<8x1xf32>
    %168 = arith.divf %166, %167 : vector<8x1xf32>
    %169 = vector.broadcast %168 : vector<8x1xf32> to vector<8x256xf32>
    %170 = arith.subf %164, %169 : vector<8x256xf32>
    %171 = arith.mulf %170, %170 : vector<8x256xf32>
    %cst_88 = arith.constant dense<0.000000e+00> : vector<8xf32>
    %172 = vector.multi_reduction <add>, %171, %cst_88 [1] : vector<8x256xf32> to vector<8xf32>
    %173 = vector.shape_cast %172 : vector<8xf32> to vector<8x1xf32>
    %cst_89 = arith.constant 2.560000e+02 : f32
    %174 = vector.broadcast %cst_89 : f32 to vector<8x1xf32>
    %175 = arith.divf %173, %174 : vector<8x1xf32>
    %cst_90 = arith.constant 9.99999974E-6 : f32
    %176 = vector.broadcast %cst_90 : f32 to vector<8x1xf32>
    %177 = arith.addf %175, %176 : vector<8x1xf32>
    %178 = math.rsqrt %177 : vector<8x1xf32>
    %179 = vector.broadcast %178 : vector<8x1xf32> to vector<8x256xf32>
    %180 = arith.mulf %170, %179 : vector<8x256xf32>
    %181 = arith.addf %1, %180 : vector<8x256xf32>
    %c0_91 = arith.constant 0 : index
    %c0_92 = arith.constant 0 : index
    %c0_93 = arith.constant 0 : index
    %182 = vector.load %arg4[%c0_91, %c0_92, %c0_93] : memref<1x8x256xf32, #tpu.memory_space<vmem>>, vector<1x8x256xf32>
    %183 = vector.shape_cast %182 : vector<1x8x256xf32> to vector<8x256xf32>
    %184 = vector.shape_cast %181 : vector<8x256xf32> to vector<1x8x256xf32>
    tpu.vector_store %arg4[%c0_91, %c0_92, %c0_93], %184 {strides = array<i32>} : memref<1x8x256xf32, #tpu.memory_space<vmem>>, vector<1x8x256xf32>,
    return
  }
  func.func @transform_0(%arg0: i32) -> (i32, i32, i32) {
    %c0_i32 = arith.constant 0 : i32
    %c0_i32_0 = arith.constant 0 : i32
    %c0_i32_1 = arith.constant 0 : i32
    return %arg0, %c0_i32, %c0_i32_0 : i32, i32, i32
  }
  func.func @transform_1(%arg0: i32) -> (i32, i32, i32) {
    %c0_i32 = arith.constant 0 : i32
    %c0_i32_0 = arith.constant 0 : i32
    %c0_i32_1 = arith.constant 0 : i32
    %c0_i32_2 = arith.constant 0 : i32
    return %c0_i32, %c0_i32_0, %c0_i32_1 : i32, i32, i32
  }
  func.func @transform_2(%arg0: i32) -> (i32, i32, i32) {
    %c0_i32 = arith.constant 0 : i32
    %c0_i32_0 = arith.constant 0 : i32
    %c0_i32_1 = arith.constant 0 : i32
    %c0_i32_2 = arith.constant 0 : i32
    return %c0_i32, %c0_i32_0, %c0_i32_1 : i32, i32, i32
  }
  func.func @transform_3(%arg0: i32) -> (i32, i32, i32) {
    %c0_i32 = arith.constant 0 : i32
    %c0_i32_0 = arith.constant 0 : i32
    %c0_i32_1 = arith.constant 0 : i32
    return %arg0, %c0_i32, %c0_i32_0 : i32, i32, i32
  }
}

</mosaic_0001>

<bundles_post_ra>
// kernel: tpu_custom_call.1
= control target key start
LH: loop header
LB: loop body
LE: loop exit
PB: predicated region body
PF: predicated region fallthrough
CT: control target
= control target key end

     0   :  { %8 = vsyncpa [#allocation3], 0  ;;  %s2479_s0 = inlined_call_operand.vmem [shape: f32[2,8,256], index: 0, kind: input, shape index: {}]   ;;  %s2480_s1 = inlined_call_operand.vmem [shape: f32[9,8,8], index: 1, kind: input, shape index: {}]   ;;  %s2481_s2 = inlined_call_operand.vmem [shape: f32[9,8,8], index: 2, kind: input, shape index: {}]   ;;  %s2482_s3 = inlined_call_operand.hbm [shape: f32[2,8,256], index: 3, kind: output, shape index: {}]  }
   0x1   :  { %10 = vsyncpa [#allocation3 + $0x1], 0  ;;  %s2057_s12 = smov 0   ;;  %s2059_s13 = smov 0  }
   0x2   :  { %s2061_s14 = smov 0   ;;  %s2063_s15 = smov 0  }
   0x3 LB: > { %s2078_s16 = sadd.s32 4294967295, %s2029_s15   ;;  %s1839_s17 = sadd.s32 4294967294, %s2029_s15   ;;  %s2029_s15 = sphi %s2063_s15, %s2496_s15   ;;  %s2025_s14 = sphi %s2061_s14, %s2495_s14   ;;  %s2021_s13 = sphi %s2059_s13, %s2494_s13   ;;  %s2017_s12 = sphi %s2057_s12, %s2493_s12  }
   0x4   : > { %s2082_s18 = sadd.s32 1, %s2029_s15   ;;  %s91_s19 = sadd.s32 1, %s2025_s14 }
   0x5   : > { %s88_s20 = ssub.s32 %s2029_s15, %s2082_s18  ;;  %p101_p0 = scmp.ne.s32.totalorder %s2025_s14, %s2021_s13 }
   0x6   : > { %p89_p1 = scmp.eq.s32.totalorder %s88_s20, 0  ;;  %p102_p2 = scmp.eq.s32.totalorder %s2078_s16, 1 }
   0x7   : > { %p107_p3 = scmp.ne.s32.totalorder %s2021_s13, %s2017_s12  ;;  %p108_p4 = scmp.eq.s32.totalorder %s1839_s17, 1 }
   0x8   : > { %s2093_s21 = scalar_select %p89_p1, %s2025_s14, %s91_s19  }
   0x9   : > { %p2095_p5 = por %p102_p2, %p101_p0  ;;  %p2099_p6 = por %p108_p4, %p107_p3 }
   0xa   : > { %p1842_p7 = scmp.ge.s32.totalorder %s2029_s15, 1  ;;  %p140_p8 = scmp.lt.s32.totalorder %s2029_s15, 3 }
   0xc   : > { %p141_p9 = pnand %p1842_p7, %p140_p8 }
   0xd   : > { %p164_p10 = scmp.lt.s32.totalorder (!%p141_p9), %s2078_s16, 1  ;;  %s2031_s29 = smov (!%p141_p9), 112   ;;  %v2033_v2 = vmov (!%p141_p9), 0.0   ;;  %v171_v3 = vlaneseq (!%p141_p9)  ;;  %v1846_v12 = vld [vmem:[%s2480_s1 + $0x8] sm:$0xff] (!%p141_p9)  ;;  %vm238_vm2 = vcmask (!%p141_p9), 64512   ;;  %v235_v32 = vld [vmem:[%s2480_s1] sm:$0xff] (!%p141_p9) }
   0xe   : > { %144 = sbr.rel (%p141_p9) target bundleno = 1692 (0x69c), region = 32  ;;  %s2032_s30 = smov (!%p141_p9), 16   ;;  %306 = vmatprep.mubr.f32.mxu0 (!%p141_p9), %v2033_v2  ;;  %1086 = vmatprep.mubr.f32.mxu1 (!%p141_p9), %v2033_v2  ;;  %v1849_v44 = vld [vmem:[%s2480_s1 + $0x10] sm:$0xff] (!%p141_p9)  ;;  %v1851_v49 = vld [vmem:[%s2480_s1 + $0x18] sm:$0xff] (!%p141_p9)  ;;  %v1853_v53 = vld [vmem:[%s2480_s1 + $0x20] sm:$0xff] (!%p141_p9) }
   0xf   : > { %v2124_v4 = vand.u32 (!%p141_p9), 127, %v171_v3  ;;  %s2034_s6 = smov (!%p141_p9), 1   ;;  %s2035_s7 = smov (!%p141_p9), 127   ;;  %v1855_v59 = vld [vmem:[%s2480_s1 + $0x28] sm:$0xff] (!%p141_p9)  ;;  %v1857_v62 = vld [vmem:[%s2480_s1 + $0x30] sm:$0xff] (!%p141_p9)  ;;  %v1859_v3 = vld [vmem:[%s2480_s1 + $0x38] sm:$0xff] (!%p141_p9) }
  0x10   : > { %v1874_v21 = vld [vmem:[%s2481_s2 + $0x30] sm:$0xff] (!%p141_p9)  ;;  %v1876_v23 = vld [vmem:[%s2481_s2 + $0x38] sm:$0xff] (!%p141_p9)  ;;  %v1878_v24 = vld [vmem:[%s2481_s2 + $0x40] sm:$0xff] (!%p141_p9) }
  0x11   : > { %vm194_vm0 = vcmp.lt.s32.totalorder (!%p141_p9), %v2124_v4, 112  ;;  %vm180_vm1 = vcmp.lt.s32.totalorder (!%p141_p9), %v2124_v4, 16  ;;  %v2151_v14 = vadd.s32 (!%p141_p9), 128, %v2124_v4  ;;  %v174_v19 = vand.u32 (!%p141_p9), 15, %v2124_v4 }
  0x12   : > { %vm213_vm4 = vcmp.lt.s32.totalorder (!%p141_p9), %v2124_v4, 1  ;;  %vm220_vm5 = vcmp.lt.s32.totalorder (!%p141_p9), %v2124_v4, 127 }
  0x13   : > { %vm183_vm3 = vcmp.ge.s32.totalorder (!%p141_p9), %v2151_v14, 240  ;;  %v175_v17 = vand.u32 (!%p141_p9), 15, %v2151_v14  ;;  %vm2182_vm7 = vcmp.eq.s32.totalorder (!%p141_p9), %v174_v19, 0  ;;  %vm2205_vm9 = vcmp.eq.s32.totalorder (!%p141_p9), %v174_v19, 15 }
  0x15   : > { %s165_s24 = scalar_select %p164_p10, %s2078_s16, 1  ;;  %vm2178_vm6 = vcmp.eq.s32.totalorder %v175_v17, 0  ;;  %vm2186_vm8 = vcmp.eq.s32.totalorder %v175_v17, 15 }
  0x17   : > { %s1885_s25 = sshll.u32 %s165_s24, 4  ;;  %s2036_s24 = smov [#allocation2]  }
  0x18   : > { %s168_s28 = scalar_lea.vmem %s2479_s0, %s1885_s25  ;;  %s1971_s25 = sshll.u32 %s2036_s24, 4  ;;  %s1972_s25 = int_to_ptr.vmem [resolvable:$false] %s1971_s25 }
  0x19   : > { %v2110_v0 = vld [vmem:[%s168_s28] sm:$0xff]  ;;  %v2116_v1 = vld [vmem:[%s168_s28 + $0x8] sm:$0xff]  ;;  %s1973_s26 = scalar_lea.vmem %s1972_s25, 512 }
  0x1a   : > { %190 = vrot.lane.b32.xlu1 %v2110_v0, %s2031_s29  ;;  %184 = vrot.lane.b32.xlu0 %v2110_v0, %s2032_s30 }
  0x1e   : > { %192 = vrot.lane.b32.xlu1 %v2116_v1, %s2031_s29  ;;  %186 = vrot.lane.b32.xlu0 %v2116_v1, %s2032_s30 }
  0x8c   : > { %v191_v5 = vpop.permute.xlu1 %190  ;;  %v185_v6 = vpop.permute.xlu0 %184 }
  0x90   : > { %v193_v7 = vpop.permute.xlu1 %192  ;;  %v187_v8 = vpop.permute.xlu0 %186 }
  0x91   : > { %v2130_v9 = vsel %vm194_vm0, %v191_v5, %v193_v7  ;;  %v188_v10 = vsel %vm180_vm1, %v185_v6, %v187_v8  ;;  %v189_v11 = vsel %vm180_vm1, %v187_v8, %v185_v6  ;;  %v196_v15 = vsel %vm194_vm0, %v193_v7, %v191_v5  ;;  %v1861_v6 = vld [vmem:[%s2480_s1 + $0x40] sm:$0xff] }
  0x92   : > { %211 = vrot.lane.b32.xlu1 %v188_v10, %s2034_s6  ;;  %242 = vmatprep.subr.mxu0 %v188_v10  ;;  %v201_v13 = vsel %vm180_vm1, %v2130_v9, %v189_v11  ;;  %v2164_v16 = vsel %vm183_vm3, %v188_v10, %v196_v15 }
  0x93   : > { %209 = vrot.lane.b32.xlu0 %v201_v13, %s2034_s6  ;;  %243 = vmatpush1.msra.mxu0 %v201_v13 }
  0x94   : > { %1847 = vmatmul.mubr.msk.f32.vlgmr.msra.gmra.mrb[0].mxu0 %vm238_vm2, %v1846_v12 }
  0x95   : > { %380 = vmatprep.mubr.f32.mxu0 %v2033_v2 }
  0x96   : > { %218 = vrot.lane.b32.xlu1 %v188_v10, %s2035_s7 }
  0x97   : > { %216 = vrot.lane.b32.xlu0 %v201_v13, %s2035_s7 }
  0x9a   : > { %467 = vrot.lane.b32.xlu1 %v2116_v1, %s2034_s6 }
  0x9b   : > { %465 = vrot.lane.b32.xlu0 %v2110_v0, %s2034_s6 }
  0x9e   : > { %473 = vrot.lane.b32.xlu1 %v2116_v1, %s2035_s7 }
  0x9f   : > { %471 = vrot.lane.b32.xlu0 %v2110_v0, %s2035_s7 }
  0xa2   : > { %717 = vrot.lane.b32.xlu1 %v2164_v16, %s2034_s6 }
  0xa3   : > { %715 = vrot.lane.b32.xlu0 %v2130_v9, %s2034_s6 }
  0xa6   : > { %723 = vrot.lane.b32.xlu1 %v2164_v16, %s2035_s7 }
  0xa7   : > { %721 = vrot.lane.b32.xlu0 %v2130_v9, %s2035_s7 }
 0x104   : > { %v212_v18 = vpop.permute.xlu1 %211 }
 0x105   : > { %v210_v20 = vpop.permute.xlu0 %209 }
 0x106   : > { %v214_v26 = vsel %vm213_vm4, %v210_v20, %v212_v18  ;;  %v215_v27 = vsel %vm213_vm4, %v212_v18, %v210_v20 }
 0x108   : > { %v219_v22 = vpop.permute.xlu1 %218 }
 0x109   : > { %v217_v25 = vpop.permute.xlu0 %216 }
 0x10a   : > { %v221_v28 = vsel %vm220_vm5, %v217_v25, %v219_v22  ;;  %v222_v29 = vsel %vm220_vm5, %v219_v22, %v217_v25 }
 0x10b   : > { %v228_v30 = vsel %vm2178_vm6, %v222_v29, %v214_v26  ;;  %v227_v31 = vsel %vm2182_vm7, %v221_v28, %v215_v27  ;;  %v234_v36 = vsel %vm2186_vm8, %v214_v26, %v222_v29  ;;  %v233_v37 = vsel %vm2205_vm9, %v215_v27, %v221_v28 }
 0x10c   : > { %v468_v34 = vpop.permute.xlu1 %467  ;;  %316 = vmatprep.subr.mxu0 %v228_v30 }
 0x10d   : > { %v466_v35 = vpop.permute.xlu0 %465  ;;  %317 = vmatpush1.msra.mxu0 %v227_v31 }
 0x10e   : > { %1848 = vmatmul.mubr.msk.f32.vlgmr.msra.gmra.mrb[0].mxu0 %vm238_vm2, %v235_v32  ;;  %392 = vmatprep.subr.mxu0 %v234_v36  ;;  %v469_v38 = vsel %vm213_vm4, %v466_v35, %v468_v34  ;;  %v470_v39 = vsel %vm213_vm4, %v468_v34, %v466_v35 }
 0x10f   : > { %393 = vmatpush1.msra.mxu0 %v233_v37  ;;  %456 = vmatprep.mubr.f32.mxu0 %v2033_v2  ;;  %v1863_v37 = vld [vmem:[%s2481_s2 + $0x8] sm:$0xff] }
 0x110   : > { %v474_v40 = vpop.permute.xlu1 %473 }
 0x111   : > { %v472_v41 = vpop.permute.xlu0 %471 }
 0x112   : > { %v475_v42 = vsel %vm220_vm5, %v472_v41, %v474_v40  ;;  %v476_v43 = vsel %vm220_vm5, %v474_v40, %v472_v41 }
 0x113   : > { %v478_v45 = vsel %vm2178_vm6, %v476_v43, %v469_v38  ;;  %v477_v46 = vsel %vm2182_vm7, %v475_v42, %v470_v39  ;;  %v480_v50 = vsel %vm2186_vm8, %v469_v38, %v476_v43  ;;  %v479_v56 = vsel %vm2205_vm9, %v470_v39, %v475_v42 }
 0x114   : > { %486 = vmatprep.subr.mxu0 %v478_v45  ;;  %v718_v47 = vpop.permute.xlu1 %717 }
 0x115   : > { %v716_v48 = vpop.permute.xlu0 %715 }
 0x116   : > { %1850 = vmatmul.mubr.msk.f32.vlgmr.msra.gmra.mrb[0].mxu0 %vm238_vm2, %v1849_v44  ;;  %v719_v55 = vsel %vm213_vm4, %v716_v48, %v718_v47  ;;  %v720_v60 = vsel %vm213_vm4, %v718_v47, %v716_v48 }
 0x117   : > { %487 = vmatpush1.msra.mxu0 %v477_v46  ;;  %550 = vmatprep.mubr.f32.mxu0 %v2033_v2 }
 0x118   : > { %564 = vmatprep.subr.mxu0 %v2116_v1  ;;  %v724_v51 = vpop.permute.xlu1 %723 }
 0x119   : > { %v722_v52 = vpop.permute.xlu0 %721 }
 0x11a   : > { %v726_v54 = vsel %vm220_vm5, %v724_v51, %v722_v52  ;;  %v725_v58 = vsel %vm220_vm5, %v722_v52, %v724_v51  ;;  %v1016_v51 = vld [vmem:[%s2481_s2] sm:$0xff] }
 0x11b   : > { %v728_v57 = vsel %vm2178_vm6, %v726_v54, %v719_v55  ;;  %v727_v61 = vsel %vm2182_vm7, %v725_v58, %v720_v60  ;;  %v730_v63 = vsel %vm2186_vm8, %v719_v55, %v726_v54  ;;  %v729_v5 = vsel %vm2205_vm9, %v720_v60, %v725_v58 }
 0x11e   : > { %1852 = vmatmul.mubr.msk.f32.vlgmr.msra.gmra.mrb[0].mxu0 %vm238_vm2, %v1851_v49 }
 0x11f   : > { %565 = vmatpush1.msra.mxu0 %v2110_v0  ;;  %628 = vmatprep.mubr.f32.mxu0 %v2033_v2 }
 0x120   : > { %642 = vmatprep.subr.mxu0 %v480_v50 }
 0x126   : > { %1854 = vmatmul.mubr.msk.f32.vlgmr.msra.gmra.mrb[0].mxu0 %vm238_vm2, %v1853_v53 }
 0x127   : > { %643 = vmatpush1.msra.mxu0 %v479_v56  ;;  %706 = vmatprep.mubr.f32.mxu0 %v2033_v2 }
 0x128   : > { %736 = vmatprep.subr.mxu0 %v728_v57 }
 0x12e   : > { %1856 = vmatmul.mubr.msk.f32.vlgmr.msra.gmra.mrb[0].mxu0 %vm238_vm2, %v1855_v59 }
 0x12f   : > { %737 = vmatpush1.msra.mxu0 %v727_v61  ;;  %800 = vmatprep.mubr.f32.mxu0 %v2033_v2  ;;  %v1866_v61 = vld [vmem:[%s2481_s2 + $0x10] sm:$0xff] }
 0x130   : > { %814 = vmatprep.subr.mxu0 %v2164_v16 }
 0x136   : > { %1858 = vmatmul.mubr.msk.f32.vlgmr.msra.gmra.mrb[0].mxu0 %vm238_vm2, %v1857_v62 }
 0x137   : > { %815 = vmatpush1.msra.mxu0 %v2130_v9  ;;  %878 = vmatprep.mubr.f32.mxu0 %v2033_v2 }
 0x138   : > { %892 = vmatprep.subr.mxu0 %v730_v63 }
 0x13e   : > { %1860 = vmatmul.mubr.msk.f32.vlgmr.msra.gmra.mrb[0].mxu0 %vm238_vm2, %v1859_v3 }
 0x13f   : > { %893 = vmatpush1.msra.mxu0 %v729_v5  ;;  %956 = vmatprep.mubr.f32.mxu0 %v2033_v2  ;;  %v1868_v5 = vld [vmem:[%s2481_s2 + $0x18] sm:$0xff] }
 0x146   : > { %1862 = vmatmul.mubr.msk.f32.vlgmr.msra.gmra.mrb[0].mxu0 %vm238_vm2, %v1861_v6 }
 0x219   : > { %v958_v7 = vpop.f32.mrb[0].mxu0 }
 0x21a   : > { %v960_v8 = vpop.f32.mrb[1].mxu0 }
 0x21b   : > { %v965_v9 = vadd.f32 %v960_v8, %v958_v7 }
 0x21d   : > { %966 = vadd.xlane.f32.xlu0 %v965_v9 }
 0x2aa   : > { %v967_v10 = vpop.xlane.xlu0 %966 }
 0x2ab   : > { %v969_v11 = vmul.f32 0.00390625, %v967_v10  ;;  %v1870_v10 = vld [vmem:[%s2481_s2 + $0x20] sm:$0xff] }
 0x2ad   : > { %v970_v12 = vsub.f32 %v958_v7, %v969_v11  ;;  %v971_v13 = vsub.f32 %v960_v8, %v969_v11 }
 0x2af   : > { %v972_v15 = vmul.f32 %v970_v12, %v970_v12  ;;  %v973_v16 = vmul.f32 %v971_v13, %v971_v13 }
 0x2b1   : > { %v974_v17 = vadd.f32 %v973_v16, %v972_v15 }
 0x2b3   : > { %975 = vadd.xlane.f32.xlu1 %v974_v17  ;;  %v1872_v17 = vld [vmem:[%s2481_s2 + $0x28] sm:$0xff] }
 0x340   : > { %v976_v18 = vpop.xlane.xlu1 %975 }
 0x341   : > { %v977_v19 = vmul.f32 0.00390625, %v976_v18 }
 0x343   : > { %v978_v20 = vadd.f32 1e-05, %v977_v19 }
 0x345   : > { %1963 = vrsqrt.f32 %v978_v20 }
 0x34f   : > { %v1964_v22 = vpop.eup %1963 }
 0x350   : > { %v981_v25 = vmul.f32 %v1964_v22, %v971_v13  ;;  %v980_v26 = vmul.f32 %v1964_v22, %v970_v12 }
 0x352   : > { %v2285_v27 = vmax.f32 %v981_v25, 0.0  ;;  %v2287_v28 = vmax.f32 %v980_v26, 0.0 }
 0x354   : > { %986 = vrot.lane.b32.xlu1 %v2285_v27, %s2032_s30  ;;  %984 = vrot.lane.b32.xlu0 %v2287_v28, %s2032_s30  ;;  %s161_s30 = sand.u32 1, %s2021_s13  }
 0x355   : > { %s1843_s10 = sshll.u32 %s161_s30, 4 }
 0x358   : > { %992 = vrot.lane.b32.xlu1 %v2285_v27, %s2031_s29  ;;  %990 = vrot.lane.b32.xlu0 %v2287_v28, %s2031_s29  ;;  %s1886_s29 = sshll.u32 %s2078_s16, 8  ;;  %s1766_s16 = scalar_lea.sflag [#allocation3], %s161_s30 }
 0x359   : > { %s2437_s19 = scalar_lea.hbm %s2482_s3, %s1886_s29 }
 0x3c6   : > { %v987_v29 = vpop.permute.xlu1 %986  ;;  %v985_v30 = vpop.permute.xlu0 %984 }
 0x3c7   : > { %v988_v31 = vsel %vm180_vm1, %v985_v30, %v987_v29  ;;  %v989_v35 = vsel %vm180_vm1, %v987_v29, %v985_v30 }
 0x3c8   : > { %1002 = vrot.lane.b32.xlu1 %v988_v31, %s2034_s6  ;;  %1022 = vmatprep.subr.mxu1 %v988_v31 }
 0x3ca   : > { %v993_v32 = vpop.permute.xlu1 %992  ;;  %v991_v34 = vpop.permute.xlu0 %990 }
 0x3cb   : > { %v2304_v36 = vsel %vm194_vm0, %v991_v34, %v993_v32  ;;  %v995_v39 = vsel %vm194_vm0, %v993_v32, %v991_v34 }
 0x3cc   : > { %1008 = vrot.lane.b32.xlu1 %v988_v31, %s2035_s7  ;;  %v996_v38 = vsel %vm180_vm1, %v2304_v36, %v989_v35  ;;  %v2327_v40 = vsel %vm183_vm3, %v988_v31, %v995_v39 }
 0x3cd   : > { %1000 = vrot.lane.b32.xlu0 %v996_v38, %s2034_s6  ;;  %1023 = vmatpush1.msra.mxu1 %v996_v38 }
 0x3ce   : > { %1864 = vmatmul.mubr.msk.f32.vlgmr.msra.gmra.mrb[0].mxu1 %vm238_vm2, %v1863_v37 }
 0x3cf   : > { %1160 = vmatprep.mubr.f32.mxu1 %v2033_v2 }
 0x3d0   : > { %1247 = vrot.lane.b32.xlu1 %v2285_v27, %s2034_s6 }
 0x3d1   : > { %1006 = vrot.lane.b32.xlu0 %v996_v38, %s2035_s7 }
 0x3d4   : > { %1253 = vrot.lane.b32.xlu1 %v2285_v27, %s2035_s7 }
 0x3d5   : > { %1245 = vrot.lane.b32.xlu0 %v2287_v28, %s2034_s6 }
 0x3d8   : > { %1497 = vrot.lane.b32.xlu1 %v2327_v40, %s2034_s6 }
 0x3d9   : > { %1251 = vrot.lane.b32.xlu0 %v2287_v28, %s2035_s7 }
 0x3dc   : > { %1503 = vrot.lane.b32.xlu1 %v2327_v40, %s2035_s7 }
 0x3dd   : > { %1495 = vrot.lane.b32.xlu0 %v2304_v36, %s2034_s6  ;;  %s163_s6 = scalar_lea.vmem [#allocation2], %s1843_s10 }
 0x3e1   : > { %1501 = vrot.lane.b32.xlu0 %v2304_v36, %s2035_s7  ;;  %s1780_s7 = sshll.u32 %s163_s6, 4  ;;  %s2439_s7 = int_to_ptr.vmem [resolvable:$true] %s1780_s7 }
 0x3e2   : > { %s1967_s20 = scalar_lea.vmem %s2439_s7, 256  ;;  %p1974_p0 = scmp.lt.s32.totalorder %s2439_s7, %s1972_s25 }
 0x3e3   : > { %p1968_p11 = scmp.ne.s32.totalorder %s2439_s7, %s1967_s20  ;;  %p1975_p1 = scmp.lt.s32.totalorder %s1973_s26, %s1967_s20 }
 0x3e5   : > { %p1969_p12 = pnand %p1968_p11, %p2095_p5  ;;  %p1976_p2 = por %p1975_p1, %p1974_p0 }
 0x3e7   : > { %p1970_p13 = pneg %p1969_p12 }
 0x3e9   : > { %p1977_p3 = pnand %p1976_p2, %p1970_p13 }
 0x43a   : > { %v1003_v41 = vpop.permute.xlu1 %1002 }
 0x43e   : > { %v1009_v42 = vpop.permute.xlu1 %1008 }
 0x43f   : > { %v1001_v14 = vpop.permute.xlu0 %1000 }
 0x440   : > { %v1004_v44 = vsel %vm213_vm4, %v1001_v14, %v1003_v41  ;;  %v1005_v45 = vsel %vm213_vm4, %v1003_v41, %v1001_v14 }
 0x442   : > { %v1248_v48 = vpop.permute.xlu1 %1247 }
 0x443   : > { %v1007_v43 = vpop.permute.xlu0 %1006 }
 0x444   : > { %v1010_v46 = vsel %vm220_vm5, %v1007_v43, %v1009_v42  ;;  %v1011_v47 = vsel %vm220_vm5, %v1009_v42, %v1007_v43 }
 0x445   : > { %v1013_v49 = vsel %vm2178_vm6, %v1011_v47, %v1004_v44  ;;  %v1012_v50 = vsel %vm2182_vm7, %v1010_v46, %v1005_v45  ;;  %v1015_v53 = vsel %vm2186_vm8, %v1004_v44, %v1011_v47  ;;  %v1014_v54 = vsel %vm2205_vm9, %v1005_v45, %v1010_v46 }
 0x446   : > { %1096 = vmatprep.subr.mxu1 %v1013_v49  ;;  %v1254_v55 = vpop.permute.xlu1 %1253 }
 0x447   : > { %v1246_v52 = vpop.permute.xlu0 %1245  ;;  %1097 = vmatpush1.msra.mxu1 %v1012_v50 }
 0x448   : > { %1865 = vmatmul.mubr.msk.f32.vlgmr.msra.gmra.mrb[0].mxu1 %vm238_vm2, %v1016_v51  ;;  %1172 = vmatprep.subr.mxu1 %v1015_v53  ;;  %v1249_v57 = vsel %vm213_vm4, %v1246_v52, %v1248_v48  ;;  %v1250_v62 = vsel %vm213_vm4, %v1248_v48, %v1246_v52 }
 0x449   : > { %1173 = vmatpush1.msra.mxu1 %v1014_v54  ;;  %1236 = vmatprep.mubr.f32.mxu1 %v2033_v2 }
 0x44a   : > { %v1498_v6 = vpop.permute.xlu1 %1497 }
 0x44b   : > { %v1252_v56 = vpop.permute.xlu0 %1251 }
 0x44c   : > { %v1256_v58 = vsel %vm220_vm5, %v1254_v55, %v1252_v56  ;;  %v1255_v59 = vsel %vm220_vm5, %v1252_v56, %v1254_v55 }
 0x44d   : > { %v1258_v60 = vsel %vm2178_vm6, %v1256_v58, %v1249_v57  ;;  %v1257_v63 = vsel %vm2182_vm7, %v1255_v59, %v1250_v62  ;;  %v1260_v7 = vsel %vm2186_vm8, %v1249_v57, %v1256_v58  ;;  %v1259_v13 = vsel %vm2205_vm9, %v1250_v62, %v1255_v59 }
 0x44e   : > { %1266 = vmatprep.subr.mxu1 %v1258_v60  ;;  %v1504_v9 = vpop.permute.xlu1 %1503 }
 0x44f   : > { %v1496_v3 = vpop.permute.xlu0 %1495 }
 0x450   : > { %1867 = vmatmul.mubr.msk.f32.vlgmr.msra.gmra.mrb[0].mxu1 %vm238_vm2, %v1866_v61  ;;  %v1499_v12 = vsel %vm213_vm4, %v1496_v3, %v1498_v6  ;;  %v1500_v18 = vsel %vm213_vm4, %v1498_v6, %v1496_v3 }
 0x451   : > { %1267 = vmatpush1.msra.mxu1 %v1257_v63  ;;  %1330 = vmatprep.mubr.f32.mxu1 %v2033_v2 }
 0x452   : > { %1344 = vmatprep.subr.mxu1 %v2285_v27 }
 0x453   : > { %v1502_v8 = vpop.permute.xlu0 %1501 }
 0x454   : > { %v1506_v11 = vsel %vm220_vm5, %v1504_v9, %v1502_v8  ;;  %v1505_v16 = vsel %vm220_vm5, %v1502_v8, %v1504_v9 }
 0x455   : > { %v1508_v15 = vsel %vm2178_vm6, %v1506_v11, %v1499_v12  ;;  %v1507_v19 = vsel %vm2182_vm7, %v1505_v16, %v1500_v18  ;;  %v1510_v4 = vsel %vm2186_vm8, %v1499_v12, %v1506_v11  ;;  %v1509_v20 = vsel %vm2205_vm9, %v1500_v18, %v1505_v16 }
 0x458   : > { %1869 = vmatmul.mubr.msk.f32.vlgmr.msra.gmra.mrb[0].mxu1 %vm238_vm2, %v1868_v5 }
 0x459   : > { %1345 = vmatpush1.msra.mxu1 %v2287_v28  ;;  %1408 = vmatprep.mubr.f32.mxu1 %v2033_v2 }
 0x45a   : > { %1422 = vmatprep.subr.mxu1 %v1260_v7 }
 0x460   : > { %1871 = vmatmul.mubr.msk.f32.vlgmr.msra.gmra.mrb[0].mxu1 %vm238_vm2, %v1870_v10 }
 0x461   : > { %1423 = vmatpush1.msra.mxu1 %v1259_v13  ;;  %1486 = vmatprep.mubr.f32.mxu1 %v2033_v2 }
 0x462   : > { %1516 = vmatprep.subr.mxu1 %v1508_v15 }
 0x468   : > { %1873 = vmatmul.mubr.msk.f32.vlgmr.msra.gmra.mrb[0].mxu1 %vm238_vm2, %v1872_v17 }
 0x469   : > { %1517 = vmatpush1.msra.mxu1 %v1507_v19  ;;  %1580 = vmatprep.mubr.f32.mxu1 %v2033_v2 }
 0x46a   : > { %1594 = vmatprep.subr.mxu1 %v2327_v40 }
 0x470   : > { %1875 = vmatmul.mubr.msk.f32.vlgmr.msra.gmra.mrb[0].mxu1 %vm238_vm2, %v1874_v21 }
 0x471   : > { %1595 = vmatpush1.msra.mxu1 %v2304_v36  ;;  %1658 = vmatprep.mubr.f32.mxu1 %v2033_v2 }
 0x472   : > { %1672 = vmatprep.subr.mxu1 %v1510_v4 }
 0x478   : > { %1877 = vmatmul.mubr.msk.f32.vlgmr.msra.gmra.mrb[0].mxu1 %vm238_vm2, %v1876_v23 }
 0x479   : > { %1673 = vmatpush1.msra.mxu1 %v1509_v20  ;;  %1736 = vmatprep.mubr.f32.mxu1 %v2033_v2 }
 0x480   : > { %1879 = vmatmul.mubr.msk.f32.vlgmr.msra.gmra.mrb[0].mxu1 %vm238_vm2, %v1878_v24 }
 0x553   : > { %v1738_v22 = vpop.f32.mrb[0].mxu1 }
 0x554   : > { %v1740_v25 = vpop.f32.mrb[1].mxu1 }
 0x555   : > { %v1745_v26 = vadd.f32 %v1740_v25, %v1738_v22 }
 0x557   : > { %1746 = vadd.xlane.f32.xlu0 %v1745_v26 }
 0x5e4   : > { %v1747_v27 = vpop.xlane.xlu0 %1746 }
 0x5e5   : > { %v1748_v28 = vmul.f32 0.00390625, %v1747_v27 }
 0x5e7   : > { %v1749_v29 = vsub.f32 %v1738_v22, %v1748_v28  ;;  %v1750_v33 = vsub.f32 %v1740_v25, %v1748_v28 }
 0x5e9   : > { %v1751_v30 = vmul.f32 %v1749_v29, %v1749_v29  ;;  %v1752_v31 = vmul.f32 %v1750_v33, %v1750_v33 }
 0x5eb   : > { %v1753_v32 = vadd.f32 %v1752_v31, %v1751_v30 }
 0x5ed   : > { %1754 = vadd.xlane.f32.xlu1 %v1753_v32 }
 0x67a   : > { %v1755_v2 = vpop.xlane.xlu1 %1754 }
 0x67b   : > { %v1756_v34 = vmul.f32 0.00390625, %v1755_v2 }
 0x67d   : > { %v1757_v35 = vadd.f32 1e-05, %v1756_v34 }
 0x67f   : > { %1965 = vrsqrt.f32 %v1757_v35 }
 0x689   : > { %v1966_v36 = vpop.eup %1965 }
 0x68a   : > { %v1759_v37 = vmul.f32 %v1966_v36, %v1749_v29  ;;  %v1760_v38 = vmul.f32 %v1966_v36, %v1750_v33 }
 0x68c   : > { %v1761_v39 = vadd.f32 %v1759_v37, %v2110_v0  ;;  %v1762_v40 = vadd.f32 %v1760_v38, %v2116_v1 }
 0x68e   : > { %1763 = vst [vmem:[%s163_s6] sm:$0xff] %v1761_v39  ;;  %1764 = vst [vmem:[%s163_s6 + $0x8] sm:$0xff] %v1762_v40 }
 0x68f   : > { %1980 = shalt.err (!%p1977_p3)
}
 0x690   : > { %s1981_s27 = scalar_lea.hbm %s2437_s19, 256  ;;  %s1985_s5 = scalar_lea.hbm %s2482_s3, 512 }
 0x691   : > { %p1982_p4 = scmp.ne.s32.totalorder %s2437_s19, %s1981_s27  ;;  %p1986_p9 = scmp.lt.u32.totalorder %s2437_s19, %s2482_s3 }
 0x692   : > { %p1987_p10 = scmp.lt.u32.totalorder %s1985_s5, %s1981_s27  ;;  %p1989_p12 = scmp.lt.u32.totalorder %s1981_s27, %s2437_s19 }
 0x693   : > { %p1983_p7 = pnand %p1982_p4, %p2095_p5 }
 0x694   : > { %p1988_p11 = por %p1987_p10, %p1986_p9 }
 0x695   : > { %p1984_p8 = pneg %p1983_p7 }
 0x696   : > { %p1990_p13 = por %p1989_p12, %p1988_p11 }
 0x698   : > { %p1991_p0 = pnand %p1990_p13, %p1984_p8 }
 0x69a   : > { %1994 = shalt.err (!%p1991_p0)
}
 0x69b   : > { %1919 = dma.vmem_to_hbm [thread:$0]  (%p2095_p5), %s2439_s7, 256, %s2437_s19, %s1766_s16  }
 0x69c PF: > { %p1925_p1 = scmp.ge.s32.totalorder %s2029_s15, 2  ;;  %s1792_s30 = sand.u32 1, %s2017_s12  }
 0x69d   : > { %s1793_s10 = scalar_lea.sflag [#allocation3], %s1792_s30 }
 0x69e   : > { %p1922_p2 = pnand %p1925_p1, %p2099_p6 }
 0x6a0   : > { %2012 = dma.done.wait (!%p1922_p2), %s1793_s10, 256  }
 0x6a1   : > { %2014 = vsyncadd (!%p1922_p2), %s1793_s10, 4294967040  ;;  %p13_p3 = scmp.ge.s32.totalorder %s2082_s18, 4   ;;  %s2493_s12 = smov %s2021_s13 }
 0x6a2   : > { %s2494_s13 = smov %s2025_s14  ;;  %s2495_s14 = smov %s2093_s21 }
 0x6a3   : > { %s2496_s15 = smov %s2082_s18  ;;  %15 = sbr.rel (!%p13_p3) target bundleno = 3 (0x3), region = 83 }
 0x6aa   :  { %1798 = vsyncpa [#allocation3], 1 }
 0x6ab   :  { %1800 = vsyncpa [#allocation3 + $0x1], 1 }

</bundles_post_ra>
